<compile_context>
chip_gen: v6e
topology: v6e:2x2x1
jax: 0.10.0
libtpu: 0.0.40
codegen_flags: <defaults>
</compile_context>

<pallas_src>
from functools import partial

import jax
import jax.numpy as jnp
from jax.experimental import pallas as pl
from jax.experimental.pallas import tpu as pltpu

LANES = 128
SUBLANES = 8


def _round_up(x, m):
    return (x + m - 1) // m * m


def bigram_kernel(ids_ref, t_ref, w2_ref, out_ref, *, vocab, matmul_dtype):
    """One batch tile of the fused Bigram forward.

    ids_ref: [TB, C]        int32 token ids (streamed per batch tile)
    t_ref:   [C, V_pad, H]  fused tables T[c] = emb_table @ W1_c (b1 folded into
                            T[0]), stored in matmul_dtype, resident in VMEM
    w2_ref:  [H, V_pad]     linear2 weight (transposed, lane-padded), resident
    out_ref: [TB, V_pad]    log-probabilities (padded lanes sliced off outside)
    """
    _, V_pad = out_ref.shape
    C = ids_ref.shape[1]

    ids = ids_ref[...]                                            # [TB, C] int32
    # Single-row lane iota; broadcasting inside the compares avoids a TB x V_pad
    # int32 live array.
    lane = jax.lax.broadcasted_iota(jnp.int32, (1, V_pad), 1)     # [1, V_pad]

    # Fused embedding-gather + linear1:  h_pre = sum_c onehot_c @ T[c]
    # One-hot is exact in bf16 (values 0/1), so the MXU runs at full bf16 rate
    # on every generation while accumulation stays f32.
    h_pre = None
    for c in range(C):                                            # static, unrolled
        onehot = (lane == ids[:, c:c + 1]).astype(jnp.bfloat16)   # [TB, V_pad]
        term = jnp.dot(onehot, t_ref[c],
                       preferred_element_type=jnp.float32)        # [TB, H]
        h_pre = term if h_pre is None else h_pre + term

    # tanh epilogue in f32 (VPU/EUP; v5e has no bf16 VPU/EUP anyway).
    h = jnp.tanh(h_pre)                                           # [TB, H]

    # linear2 (no bias), lane-dense padded vocab.
    logits = jnp.dot(h.astype(matmul_dtype), w2_ref[...],
                     preferred_element_type=jnp.float32)          # [TB, V_pad]

    # Mask padded vocab lanes out of the softmax (skip when vocab is lane-aligned).
    if V_pad != vocab:
        logits = jnp.where(lane < vocab, logits, jnp.float32(-1e30))

    # Numerically-stable log_softmax over the vocab axis (f32).
    m = jnp.max(logits, axis=1, keepdims=True)
    shifted = logits - m
    lse = jnp.log(jnp.sum(jnp.exp(shifted), axis=1, keepdims=True))
    out_ref[...] = (shifted - lse).astype(out_ref.dtype)


def _vmem_capacity_bytes():
    try:
        return int(pltpu.get_tpu_info().vmem_capacity_bytes)
    except Exception:
        return 64 << 20                       # conservative: v7x per-TC VMEM


def _choose_batch_tile(B, C, V_pad, H, mm_bytes, out_bytes, block_b, vmem_budget):
    """Batch tile: multiple of 8 sublanes, MXU-M aligned when large, sized to the
    VMEM budget, and capped so the batch grid has >= 2 steps when possible so the
    ("parallel",) axis keeps both v7x TensorCores busy."""
    B8 = _round_up(max(B, 1), SUBLANES)
    # Per-batch-row VMEM bytes of tiled buffers / big temporaries:
    #   output x2 pipeline buffers, f32 logits, bf16 one-hot, h_pre/h, ids x2.
    per_row = V_pad * (2 * out_bytes + 4 + 2) + 2 * H * 4 + 2 * C * 4
    # Resident operands; budget for the worst case (double-buffered).
    resident = 2 * (C * V_pad * H + H * V_pad) * mm_bytes
    avail = max(vmem_budget - resident - (4 << 20), 1 << 20)      # 4 MiB headroom
    tb = min(block_b, B8, max(SUBLANES, int(avail // per_row)))
    if B8 >= 2 * SUBLANES:                    # guarantee >= 2 grid steps if possible
        tb = min(tb, _round_up(B8 // 2, SUBLANES))
    if tb >= 256:                             # MXU M-tile alignment (v6e/v7x)
        tb = (tb // 256) * 256
    elif tb >= 128:                           # v5e MXU is 128 rows
        tb = (tb // 128) * 128
    return max(SUBLANES, (tb // SUBLANES) * SUBLANES)


def bigram_forward(inputs, emb_table, w1, b1, w2, *, block_b=512,
                   matmul_dtype=jnp.bfloat16, out_dtype=jnp.float32):
    """Forward pass of BigramNNmodel.

    inputs:    [B, context] integer token ids
    emb_table: [vocab, emb]            (nn.Embedding.weight)
    w1:        [context*emb, hidden]   (linear1.weight, transposed vs PyTorch)
    b1:        [1, hidden]             (linear1.bias)
    w2:        [hidden, vocab]         (linear2.weight, transposed; no bias)

    matmul_dtype=bf16 (default) feeds the MXU at full rate on v5e/v6e/v7x with
    f32 accumulation and an f32 tanh/log_softmax epilogue (expect ~1e-2-scale
    rounding vs. a full-f32 reference). Pass jnp.float32 for a tight match.
    out_dtype=bf16 halves the HBM writeback for large-vocab deployments.
    """
    B, C = inputs.shape
    V, E = emb_table.shape
    ce, H = w1.shape
    assert ce == C * E and w2.shape == (H, V) and b1.shape == (1, H)

    V_pad = _round_up(V, LANES)
    mm_bytes = jnp.dtype(matmul_dtype).itemsize
    out_bytes = jnp.dtype(out_dtype).itemsize

    # ---- One-time wrapper-side parameter prep ---------------------------
    # Fused first layer: T[c] = emb_table @ W1[c*E:(c+1)*E, :]; b1 is folded
    # into T[0] (each one-hot row sums to 1, so b1 is added exactly once).
    w1_3d = w1.astype(jnp.float32).reshape(C, E, H)
    t = jnp.einsum("ve,ceh->cvh", emb_table.astype(jnp.float32), w1_3d,
                   precision=jax.lax.Precision.HIGHEST)            # [C, V, H]
    t = t.at[0].add(b1.astype(jnp.float32))
    # Lane-pad the vocab axis; padded T rows are never selected by the one-hot,
    # padded W2 columns are masked to -inf before the softmax.
    t_p = jnp.zeros((C, V_pad, H), jnp.float32).at[:, :V, :].set(t).astype(matmul_dtype)
    w2_p = jnp.zeros((H, V_pad), jnp.float32).at[:, :V].set(
        w2.astype(jnp.float32)).astype(matmul_dtype)

    # ---- Batch tiling -----------------------------------------------------
    vmem_cap = _vmem_capacity_bytes()
    TB = _choose_batch_tile(B, C, V_pad, H, mm_bytes, out_bytes, block_b,
                            int(vmem_cap * 0.9))
    B_pad = _round_up(B, TB)
    ids = inputs.astype(jnp.int32)
    if B_pad != B:
        ids = jnp.zeros((B_pad, C), jnp.int32).at[:B, :].set(ids)
    grid = (B_pad // TB,)

    kernel = partial(bigram_kernel, vocab=V, matmul_dtype=matmul_dtype)

    # Advisory cost estimate (one fused gather-projection dot per context + linear2).
    flops = 2 * B_pad * (C * V_pad * H + H * V_pad)
    transcendentals = B_pad * (V_pad + H)
    bytes_accessed = (4 * ids.size + mm_bytes * (t_p.size + w2_p.size)
                      + out_bytes * B_pad * V_pad)
    cost = pl.CostEstimate(flops=flops, transcendentals=transcendentals,
                           bytes_accessed=bytes_accessed)

    # Explicit VMEM limit (scoped defaults are 16/32 MiB, far below physical).
    resident_bytes = mm_bytes * (t_p.size + w2_p.size)
    per_step_bytes = TB * (2 * C * 4 + V_pad * (2 * out_bytes + 4 + 2) + 2 * H * 4)
    vmem_limit = int(min(vmem_cap,
                         max(32 << 20, 2 * (2 * resident_bytes + per_step_bytes))))

    def build(single_buffer_resident):
        resident_kw = ({"pipeline_mode": pl.Buffered(1)}
                       if single_buffer_resident else {})
        return pl.pallas_call(
            kernel,
            out_shape=jax.ShapeDtypeStruct((B_pad, V_pad), out_dtype),
            grid_spec=pltpu.PrefetchScalarGridSpec(
                num_scalar_prefetch=0,
                grid=grid,
                in_specs=[
                    # Streamed per batch tile: tiny int32 token ids.
                    pl.BlockSpec((TB, C), lambda i: (i, 0)),
                    # Resident (constant index_map) fused tables + W2.
                    pl.BlockSpec((C, V_pad, H), lambda i: (0, 0, 0), **resident_kw),
                    pl.BlockSpec((H, V_pad), lambda i: (0, 0), **resident_kw),
                ],
                out_specs=pl.BlockSpec((TB, V_pad), lambda i: (i, 0)),
            ),
            compiler_params=pltpu.CompilerParams(
                dimension_semantics=("parallel",),
                vmem_limit_bytes=vmem_limit,
            ),
            cost_estimate=cost,
        )

    # Note: for very large vocabularies the next lever is tiling the vocab axis
    # with a two-pass / online log-softmax so TB x V_pad f32 logits never
    # materialize per step; not needed at these sizes.
    try:
        # Single-buffer the constant-index_map resident operands (halves their
        # VMEM footprint with zero pipelining loss).
        out_padded = jax.block_until_ready(build(True)(ids, t_p, w2_p))
    except Exception:
        # Fallback if this JAX/Mosaic version rejects pl.Buffered(1) here;
        # correctness is identical with default double-buffering.
        out_padded = jax.block_until_ready(build(False)(ids, t_p, w2_p))

    # Strip batch + vocab padding.
    return out_padded[:B, :V]


if __name__ == "__main__":
    # Small shapes consistent with the module's forward.
    vocab_size = 64
    embedding_dim = 16
    context_size = 2
    hidden_dim = 32
    batch = 8

    key = jax.random.PRNGKey(0)
    k_emb, k_w1, k_b1, k_w2, k_in = jax.random.split(key, 5)

    # Deterministic synthetic parameters (shapes match nn.Embedding / nn.Linear).
    emb_table = jax.random.normal(k_emb, (vocab_size, embedding_dim), jnp.float32)
    # nn.Linear(context*emb, hidden): weight [hidden, context*emb] -> stored transposed.
    w1 = jax.random.normal(k_w1, (context_size * embedding_dim, hidden_dim),
                           jnp.float32) * 0.1
    b1 = jax.random.normal(k_b1, (1, hidden_dim), jnp.float32) * 0.1
    # nn.Linear(hidden, vocab, bias=False): weight [vocab, hidden] -> stored transposed.
    w2 = jax.random.normal(k_w2, (hidden_dim, vocab_size), jnp.float32) * 0.1

    # Integer token inputs [batch, context_size].
    inputs = jax.random.randint(k_in, (batch, context_size), 0, vocab_size,
                                dtype=jnp.int32)

    # Reference (PyTorch-equivalent) forward in plain JAX at highest precision.
    embeds_ref = jnp.take(emb_table, inputs, axis=0).reshape(batch, -1)
    h_ref = jnp.tanh(
        jnp.dot(embeds_ref, w1, precision=jax.lax.Precision.HIGHEST) + b1)
    logits_ref = jnp.dot(h_ref, w2, precision=jax.lax.Precision.HIGHEST)
    ref = jax.nn.log_softmax(logits_ref, axis=1)

    # --- f32 matmul path: tight reference check --------------------------
    out_f32 = jax.block_until_ready(
        bigram_forward(inputs, emb_table, w1, b1, w2, matmul_dtype=jnp.float32))
    assert out_f32.shape == (batch, vocab_size)
    row_sums = jnp.exp(out_f32).sum(axis=1)
    assert jnp.allclose(row_sums, jnp.ones_like(row_sums), atol=1e-4)
    assert jnp.allclose(out_f32, ref, atol=1e-4), float(
        jnp.max(jnp.abs(out_f32 - ref)))

    # --- bf16 matmul path (default; full-rate MXU on v5e/v6e/v7x) --------
    # bf16 matmul inputs round weights/activations to ~2^-9 relative precision,
    # so the tolerance is correspondingly looser (documented precision tradeoff).
    out_bf16 = jax.block_until_ready(
        bigram_forward(inputs, emb_table, w1, b1, w2))
    assert out_bf16.shape == (batch, vocab_size)
    row_sums = jnp.exp(out_bf16).sum(axis=1)
    assert jnp.allclose(row_sums, jnp.ones_like(row_sums), atol=1e-4)
    assert jnp.allclose(out_bf16, ref, atol=5e-2), float(
        jnp.max(jnp.abs(out_bf16 - ref)))

    print("KERNEL_OK")
</pallas_src>

<mosaic_0001>
module attributes {stable_mosaic.version = 11 : i64} {
  func.func @bigram_kernel(%arg0: i32, %arg1: memref<8x2xi32, #tpu.memory_space<vmem>>, %arg2: memref<2x128x32xf32, #tpu.memory_space<vmem>>, %arg3: memref<32x128xf32, #tpu.memory_space<vmem>>, %arg4: memref<8x128xf32, #tpu.memory_space<vmem>>) attributes {dimension_semantics = [#tpu.dimension_semantics<parallel>], iteration_bounds = array<i64: 1>, scalar_prefetch = 0 : i64, scratch_operands = 0 : i64, tpu.core_type = #tpu.core_type<tc>, window_params = [{transform_indices = @transform_0, window_bounds = array<i64: 8, 2>}, {pipeline_mode = #tpu.pipeline_mode<synchronous>, transform_indices = @transform_1, window_bounds = array<i64: 2, 128, 32>}, {pipeline_mode = #tpu.pipeline_mode<synchronous>, transform_indices = @transform_2, window_bounds = array<i64: 32, 128>}, {transform_indices = @transform_3, window_bounds = array<i64: 8, 128>}]} {
    %c0 = arith.constant 0 : index
    %c0_0 = arith.constant 0 : index
    %0 = vector.load %arg1[%c0, %c0_0] : memref<8x2xi32, #tpu.memory_space<vmem>>, vector<8x2xi32>
    %1 = tpu.iota {dimensions = array<i32: 1>} : vector<1x128xi32>
    %2 = vector.extract_strided_slice %0 {offsets = [0, 0], sizes = [8, 1], strides = [1, 1]} : vector<8x2xi32> to vector<8x1xi32>
    %3 = vector.broadcast %1 : vector<1x128xi32> to vector<8x128xi32>
    %4 = vector.broadcast %2 : vector<8x1xi32> to vector<8x128xi32>
    %5 = arith.cmpi eq, %3, %4 : vector<8x128xi32>
    %6 = arith.extui %5 : vector<8x128xi1> to vector<8x128xi32>
    %7 = arith.sitofp %6 : vector<8x128xi32> to vector<8x128xf32>
    %8 = arith.truncf %7 : vector<8x128xf32> to vector<8x128xbf16>
    %c0_1 = arith.constant 0 : index
    %c0_2 = arith.constant 0 : index
    %c0_3 = arith.constant 0 : index
    %9 = vector.load %arg2[%c0_1, %c0_2, %c0_3] : memref<2x128x32xf32, #tpu.memory_space<vmem>>, vector<1x128x32xf32>
    %10 = vector.shape_cast %9 : vector<1x128x32xf32> to vector<128x32xf32>
    %cst = arith.constant dense<0.000000e+00> : vector<8x32xf32>
    %11 = tpu.matmul %8, %10, %cst {dimension_numbers = #tpu.dot_dimension_numbers<[1], [0], [0], [1], [0, 0, 1, 1], [], []>} : vector<8x128xbf16>, vector<128x32xf32>, vector<8x32xf32> -> vector<8x32xf32>
    %12 = vector.extract_strided_slice %0 {offsets = [0, 1], sizes = [8, 1], strides = [1, 1]} : vector<8x2xi32> to vector<8x1xi32>
    %13 = vector.broadcast %1 : vector<1x128xi32> to vector<8x128xi32>
    %14 = vector.broadcast %12 : vector<8x1xi32> to vector<8x128xi32>
    %15 = arith.cmpi eq, %13, %14 : vector<8x128xi32>
    %16 = arith.extui %15 : vector<8x128xi1> to vector<8x128xi32>
    %17 = arith.sitofp %16 : vector<8x128xi32> to vector<8x128xf32>
    %18 = arith.truncf %17 : vector<8x128xf32> to vector<8x128xbf16>
    %c1 = arith.constant 1 : index
    %c0_4 = arith.constant 0 : index
    %c0_5 = arith.constant 0 : index
    %19 = vector.load %arg2[%c1, %c0_4, %c0_5] : memref<2x128x32xf32, #tpu.memory_space<vmem>>, vector<1x128x32xf32>
    %20 = vector.shape_cast %19 : vector<1x128x32xf32> to vector<128x32xf32>
    %cst_6 = arith.constant dense<0.000000e+00> : vector<8x32xf32>
    %21 = tpu.matmul %18, %20, %cst_6 {dimension_numbers = #tpu.dot_dimension_numbers<[1], [0], [0], [1], [0, 0, 1, 1], [], []>} : vector<8x128xbf16>, vector<128x32xf32>, vector<8x32xf32> -> vector<8x32xf32>
    %22 = arith.addf %11, %21 : vector<8x32xf32>
    %23 = math.tanh %22 : vector<8x32xf32>
    %c0_7 = arith.constant 0 : index
    %c0_8 = arith.constant 0 : index
    %24 = vector.load %arg3[%c0_7, %c0_8] : memref<32x128xf32, #tpu.memory_space<vmem>>, vector<32x128xf32>
    %cst_9 = arith.constant dense<0.000000e+00> : vector<8x128xf32>
    %25 = tpu.matmul %23, %24, %cst_9 {dimension_numbers = #tpu.dot_dimension_numbers<[1], [0], [0], [1], [0, 0, 1, 1], [], []>} : vector<8x32xf32>, vector<32x128xf32>, vector<8x128xf32> -> vector<8x128xf32>
    %c64_i32 = arith.constant 64 : i32
    %26 = vector.broadcast %c64_i32 : i32 to vector<1x128xi32>
    %27 = arith.cmpi slt, %1, %26 : vector<1x128xi32>
    %cst_10 = arith.constant -1.000000e+30 : f32
    %28 = vector.shape_cast %27 : vector<1x128xi1> to vector<1x128xi1>
    %29 = vector.broadcast %28 : vector<1x128xi1> to vector<8x128xi1>
    %30 = vector.broadcast %cst_10 : f32 to vector<8x128xf32>
    %31 = arith.select %29, %25, %30 : vector<8x128xi1>, vector<8x128xf32>
    %cst_11 = arith.constant dense<0xFF800000> : vector<8xf32>
    %32 = vector.multi_reduction <maximumf>, %31, %cst_11 [1] : vector<8x128xf32> to vector<8xf32>
    %33 = vector.shape_cast %32 : vector<8xf32> to vector<8x1xf32>
    %34 = vector.broadcast %33 : vector<8x1xf32> to vector<8x128xf32>
    %35 = arith.subf %31, %34 : vector<8x128xf32>
    %36 = math.exp %35 : vector<8x128xf32>
    %cst_12 = arith.constant dense<0.000000e+00> : vector<8xf32>
    %37 = vector.multi_reduction <add>, %36, %cst_12 [1] : vector<8x128xf32> to vector<8xf32>
    %38 = vector.shape_cast %37 : vector<8xf32> to vector<8x1xf32>
    %39 = math.log %38 : vector<8x1xf32>
    %40 = vector.broadcast %39 : vector<8x1xf32> to vector<8x128xf32>
    %41 = arith.subf %35, %40 : vector<8x128xf32>
    %c0_13 = arith.constant 0 : index
    %c0_14 = arith.constant 0 : index
    %42 = vector.load %arg4[%c0_13, %c0_14] : memref<8x128xf32, #tpu.memory_space<vmem>>, vector<8x128xf32>
    tpu.vector_store %arg4[%c0_13, %c0_14], %41 {strides = array<i32>} : memref<8x128xf32, #tpu.memory_space<vmem>>, vector<8x128xf32>,
    return
  }
  func.func @transform_0(%arg0: i32) -> (i32, i32) {
    %c0_i32 = arith.constant 0 : i32
    %c0_i32_0 = arith.constant 0 : i32
    return %arg0, %c0_i32 : i32, i32
  }
  func.func @transform_1(%arg0: i32) -> (i32, i32, i32) {
    %c0_i32 = arith.constant 0 : i32
    %c0_i32_0 = arith.constant 0 : i32
    %c0_i32_1 = arith.constant 0 : i32
    %c0_i32_2 = arith.constant 0 : i32
    return %c0_i32, %c0_i32_0, %c0_i32_1 : i32, i32, i32
  }
  func.func @transform_2(%arg0: i32) -> (i32, i32) {
    %c0_i32 = arith.constant 0 : i32
    %c0_i32_0 = arith.constant 0 : i32
    %c0_i32_1 = arith.constant 0 : i32
    return %c0_i32, %c0_i32_0 : i32, i32
  }
  func.func @transform_3(%arg0: i32) -> (i32, i32) {
    %c0_i32 = arith.constant 0 : i32
    %c0_i32_0 = arith.constant 0 : i32
    return %arg0, %c0_i32 : i32, i32
  }
}

module attributes {stable_mosaic.version = 11 : i64} {
  func.func @bigram_kernel(%arg0: i32, %arg1: memref<8x2xi32, #tpu.memory_space<vmem>>, %arg2: memref<2x128x32xf32, #tpu.memory_space<vmem>>, %arg3: memref<32x128xf32, #tpu.memory_space<vmem>>, %arg4: memref<8x128xf32, #tpu.memory_space<vmem>>) attributes {dimension_semantics = [#tpu.dimension_semantics<parallel>], iteration_bounds = array<i64: 1>, scalar_prefetch = 0 : i64, scratch_operands = 0 : i64, tpu.core_type = #tpu.core_type<tc>, window_params = [{transform_indices = @transform_0, window_bounds = array<i64: 8, 2>}, {pipeline_mode = #tpu.pipeline_mode<synchronous>, transform_indices = @transform_1, window_bounds = array<i64: 2, 128, 32>}, {pipeline_mode = #tpu.pipeline_mode<synchronous>, transform_indices = @transform_2, window_bounds = array<i64: 32, 128>}, {transform_indices = @transform_3, window_bounds = array<i64: 8, 128>}]} {
    %c0 = arith.constant 0 : index
    %c0_0 = arith.constant 0 : index
    %0 = vector.load %arg1[%c0, %c0_0] : memref<8x2xi32, #tpu.memory_space<vmem>>, vector<8x2xi32>
    %1 = tpu.iota {dimensions = array<i32: 1>} : vector<1x128xi32>
    %2 = vector.extract_strided_slice %0 {offsets = [0, 0], sizes = [8, 1], strides = [1, 1]} : vector<8x2xi32> to vector<8x1xi32>
    %3 = vector.broadcast %1 : vector<1x128xi32> to vector<8x128xi32>
    %4 = vector.broadcast %2 : vector<8x1xi32> to vector<8x128xi32>
    %5 = arith.cmpi eq, %3, %4 : vector<8x128xi32>
    %6 = arith.extui %5 : vector<8x128xi1> to vector<8x128xi32>
    %7 = arith.sitofp %6 : vector<8x128xi32> to vector<8x128xf32>
    %8 = arith.truncf %7 : vector<8x128xf32> to vector<8x128xbf16>
    %c0_1 = arith.constant 0 : index
    %c0_2 = arith.constant 0 : index
    %c0_3 = arith.constant 0 : index
    %9 = vector.load %arg2[%c0_1, %c0_2, %c0_3] : memref<2x128x32xf32, #tpu.memory_space<vmem>>, vector<1x128x32xf32>
    %10 = vector.shape_cast %9 : vector<1x128x32xf32> to vector<128x32xf32>
    %cst = arith.constant dense<0.000000e+00> : vector<8x32xf32>
    %11 = tpu.matmul %8, %10, %cst {dimension_numbers = #tpu.dot_dimension_numbers<[1], [0], [0], [1], [0, 0, 1, 1], [], []>} : vector<8x128xbf16>, vector<128x32xf32>, vector<8x32xf32> -> vector<8x32xf32>
    %12 = vector.extract_strided_slice %0 {offsets = [0, 1], sizes = [8, 1], strides = [1, 1]} : vector<8x2xi32> to vector<8x1xi32>
    %13 = vector.broadcast %1 : vector<1x128xi32> to vector<8x128xi32>
    %14 = vector.broadcast %12 : vector<8x1xi32> to vector<8x128xi32>
    %15 = arith.cmpi eq, %13, %14 : vector<8x128xi32>
    %16 = arith.extui %15 : vector<8x128xi1> to vector<8x128xi32>
    %17 = arith.sitofp %16 : vector<8x128xi32> to vector<8x128xf32>
    %18 = arith.truncf %17 : vector<8x128xf32> to vector<8x128xbf16>
    %c1 = arith.constant 1 : index
    %c0_4 = arith.constant 0 : index
    %c0_5 = arith.constant 0 : index
    %19 = vector.load %arg2[%c1, %c0_4, %c0_5] : memref<2x128x32xf32, #tpu.memory_space<vmem>>, vector<1x128x32xf32>
    %20 = vector.shape_cast %19 : vector<1x128x32xf32> to vector<128x32xf32>
    %cst_6 = arith.constant dense<0.000000e+00> : vector<8x32xf32>
    %21 = tpu.matmul %18, %20, %cst_6 {dimension_numbers = #tpu.dot_dimension_numbers<[1], [0], [0], [1], [0, 0, 1, 1], [], []>} : vector<8x128xbf16>, vector<128x32xf32>, vector<8x32xf32> -> vector<8x32xf32>
    %22 = arith.addf %11, %21 : vector<8x32xf32>
    %23 = math.tanh %22 : vector<8x32xf32>
    %c0_7 = arith.constant 0 : index
    %c0_8 = arith.constant 0 : index
    %24 = vector.load %arg3[%c0_7, %c0_8] : memref<32x128xf32, #tpu.memory_space<vmem>>, vector<32x128xf32>
    %cst_9 = arith.constant dense<0.000000e+00> : vector<8x128xf32>
    %25 = tpu.matmul %23, %24, %cst_9 {dimension_numbers = #tpu.dot_dimension_numbers<[1], [0], [0], [1], [0, 0, 1, 1], [], []>} : vector<8x32xf32>, vector<32x128xf32>, vector<8x128xf32> -> vector<8x128xf32>
    %c64_i32 = arith.constant 64 : i32
    %26 = vector.broadcast %c64_i32 : i32 to vector<1x128xi32>
    %27 = arith.cmpi slt, %1, %26 : vector<1x128xi32>
    %cst_10 = arith.constant -1.000000e+30 : f32
    %28 = vector.shape_cast %27 : vector<1x128xi1> to vector<1x128xi1>
    %29 = vector.broadcast %28 : vector<1x128xi1> to vector<8x128xi1>
    %30 = vector.broadcast %cst_10 : f32 to vector<8x128xf32>
    %31 = arith.select %29, %25, %30 : vector<8x128xi1>, vector<8x128xf32>
    %cst_11 = arith.constant dense<0xFF800000> : vector<8xf32>
    %32 = vector.multi_reduction <maximumf>, %31, %cst_11 [1] : vector<8x128xf32> to vector<8xf32>
    %33 = vector.shape_cast %32 : vector<8xf32> to vector<8x1xf32>
    %34 = vector.broadcast %33 : vector<8x1xf32> to vector<8x128xf32>
    %35 = arith.subf %31, %34 : vector<8x128xf32>
    %36 = math.exp %35 : vector<8x128xf32>
    %cst_12 = arith.constant dense<0.000000e+00> : vector<8xf32>
    %37 = vector.multi_reduction <add>, %36, %cst_12 [1] : vector<8x128xf32> to vector<8xf32>
    %38 = vector.shape_cast %37 : vector<8xf32> to vector<8x1xf32>
    %39 = math.log %38 : vector<8x1xf32>
    %40 = vector.broadcast %39 : vector<8x1xf32> to vector<8x128xf32>
    %41 = arith.subf %35, %40 : vector<8x128xf32>
    %c0_13 = arith.constant 0 : index
    %c0_14 = arith.constant 0 : index
    %42 = vector.load %arg4[%c0_13, %c0_14] : memref<8x128xf32, #tpu.memory_space<vmem>>, vector<8x128xf32>
    tpu.vector_store %arg4[%c0_13, %c0_14], %41 {strides = array<i32>} : memref<8x128xf32, #tpu.memory_space<vmem>>, vector<8x128xf32>,
    return
  }
  func.func @transform_0(%arg0: i32) -> (i32, i32) {
    %c0_i32 = arith.constant 0 : i32
    %c0_i32_0 = arith.constant 0 : i32
    return %arg0, %c0_i32 : i32, i32
  }
  func.func @transform_1(%arg0: i32) -> (i32, i32, i32) {
    %c0_i32 = arith.constant 0 : i32
    %c0_i32_0 = arith.constant 0 : i32
    %c0_i32_1 = arith.constant 0 : i32
    %c0_i32_2 = arith.constant 0 : i32
    return %c0_i32, %c0_i32_0, %c0_i32_1 : i32, i32, i32
  }
  func.func @transform_2(%arg0: i32) -> (i32, i32) {
    %c0_i32 = arith.constant 0 : i32
    %c0_i32_0 = arith.constant 0 : i32
    %c0_i32_1 = arith.constant 0 : i32
    return %c0_i32, %c0_i32_0 : i32, i32
  }
  func.func @transform_3(%arg0: i32) -> (i32, i32) {
    %c0_i32 = arith.constant 0 : i32
    %c0_i32_0 = arith.constant 0 : i32
    return %arg0, %c0_i32 : i32, i32
  }
}

</mosaic_0001>

<bundles_post_ra>
// kernel: tpu_custom_call.1
= control target key start
LH: loop header
LB: loop body
LE: loop exit
PB: predicated region body
PF: predicated region fallthrough
CT: control target
= control target key end

     0   :  { %v499_v2 = vmov 0   ;;  %v500_v3 = vmov 0.0   ;;  %v501_v9 = vmov 1   ;;  %s681_s0 = inlined_call_operand.vmem [shape: s32[8,2], index: 0, kind: input, shape index: {}]   ;;  %s682_s1 = inlined_call_operand.vmem [shape: f32[2,128,32], index: 1, kind: input, shape index: {}]   ;;  %s683_s2 = inlined_call_operand.vmem [shape: f32[32,128], index: 2, kind: input, shape index: {}]   ;;  %s684_s3 = inlined_call_operand.hbm [shape: f32[8,128], index: 3, kind: output, shape index: {}]  }
   0x1   :  { %v16_v0 = vld [vmem:[%s681_s0] sm:$0xff]  ;;  %v41_v1 = vld [vmem:[%s682_s1 + $0x78] sm:$0xff]  ;;  %469 = vset.pattern.permute.xlu0 %v499_v2  ;;  %416 = vmatprep.subr.mxu1 %v500_v3  ;;  %v40_v4 = vld [vmem:[%s682_s1 + $0x70] sm:$0xff] }
   0x2   :  { %v335_v5 = vld [vmem:[%s682_s1 + $0xf8] sm:$0xff]  ;;  %20 = vperm.xlu0 %469, %v16_v0   ;;  %417 = vmatpush3.msra.mxu1 %v41_v1  ;;  %v39_v6 = vld [vmem:[%s682_s1 + $0x68] sm:$0xff]  ;;  %v38_v7 = vld [vmem:[%s682_s1 + $0x60] sm:$0xff] }
   0x3   :  { %418 = vmatprep.subr.mxu1 %v500_v3  ;;  %380 = vmatprep.subr.mxu0 %v500_v3  ;;  %v334_v8 = vld [vmem:[%s682_s1 + $0xf0] sm:$0xff]  ;;  %v37_v10 = vld [vmem:[%s682_s1 + $0x58] sm:$0xff]  ;;  %v333_v11 = vld [vmem:[%s682_s1 + $0xe8] sm:$0xff] }
   0x4   :  { %419 = vmatpush3.msra.mxu1 %v40_v4  ;;  %381 = vmatpush3.msra.mxu0 %v335_v5  ;;  %v36_v12 = vld [vmem:[%s682_s1 + $0x50] sm:$0xff]  ;;  %v332_v13 = vld [vmem:[%s682_s1 + $0xe0] sm:$0xff]  ;;  %v35_v14 = vld [vmem:[%s682_s1 + $0x48] sm:$0xff] }
   0x5   :  { %420 = vmatprep.subr.mxu1 %v500_v3  ;;  %382 = vmatprep.subr.mxu0 %v500_v3  ;;  %v331_v15 = vld [vmem:[%s682_s1 + $0xd8] sm:$0xff] }
   0x6   :  { %470 = vset.pattern.permute.xlu0 %v501_v9  ;;  %421 = vmatpush3.msra.mxu1 %v39_v6 }
   0x7   :  { %43 = vperm.xlu0 %470, %v16_v0   ;;  %422 = vmatprep.subr.mxu1 %v500_v3 }
   0x8   :  { %423 = vmatpush3.msra.mxu1 %v38_v7  ;;  %383 = vmatpush3.msra.mxu0 %v334_v8 }
   0x9   :  { %424 = vmatprep.subr.mxu1 %v500_v3  ;;  %384 = vmatprep.subr.mxu0 %v500_v3 }
   0xa   :  { %425 = vmatpush3.msra.mxu1 %v37_v10  ;;  %385 = vmatpush3.msra.mxu0 %v333_v11 }
   0xb   :  { %426 = vmatprep.subr.mxu1 %v500_v3  ;;  %386 = vmatprep.subr.mxu0 %v500_v3 }
   0xc   :  { %8 = vsyncpa [#allocation3], 0  ;;  %427 = vmatpush3.msra.mxu1 %v36_v12  ;;  %387 = vmatpush3.msra.mxu0 %v332_v13  ;;  %v34_v16 = vld [vmem:[%s682_s1 + $0x40] sm:$0xff]  ;;  %v330_v17 = vld [vmem:[%s682_s1 + $0xd0] sm:$0xff]  ;;  %vm502_vm0 = vmmov 0   ;;  %v17_v36 = vlaneseq  ;;  %vm215_vm5 = vcmask 261120  }
   0xd   :  { %428 = vmatprep.subr.mxu1 %v500_v3  ;;  %388 = vmatprep.subr.mxu0 %v500_v3  ;;  %v33_v18 = vld [vmem:[%s682_s1 + $0x38] sm:$0xff]  ;;  %v329_v19 = vld [vmem:[%s682_s1 + $0xc8] sm:$0xff]  ;;  %v32_v20 = vld [vmem:[%s682_s1 + $0x30] sm:$0xff]  ;;  %v503_v39 = vmov 1.0|1.0  }
   0xe   :  { %429 = vmatpush3.msra.mxu1 %v35_v14  ;;  %389 = vmatpush3.msra.mxu0 %v331_v15  ;;  %v328_v21 = vld [vmem:[%s682_s1 + $0xc0] sm:$0xff]  ;;  %v31_v22 = vld [vmem:[%s682_s1 + $0x28] sm:$0xff]  ;;  %v327_v23 = vld [vmem:[%s682_s1 + $0xb8] sm:$0xff]  ;;  %v18_v37 = vand.u32 127, %v17_v36 }
   0xf   :  { %430 = vmatprep.subr.mxu1 %v500_v3  ;;  %390 = vmatprep.subr.mxu0 %v500_v3  ;;  %v30_v24 = vld [vmem:[%s682_s1 + $0x20] sm:$0xff]  ;;  %v326_v25 = vld [vmem:[%s682_s1 + $0xb0] sm:$0xff]  ;;  %v29_v26 = vld [vmem:[%s682_s1 + $0x18] sm:$0xff] }
  0x10   :  { %431 = vmatpush3.msra.mxu1 %v34_v16  ;;  %391 = vmatpush3.msra.mxu0 %v330_v17  ;;  %v325_v27 = vld [vmem:[%s682_s1 + $0xa8] sm:$0xff]  ;;  %v28_v28 = vld [vmem:[%s682_s1 + $0x10] sm:$0xff]  ;;  %v324_v29 = vld [vmem:[%s682_s1 + $0xa0] sm:$0xff]  ;;  %vm289_vm6 = vcmp.lt.s32.totalorder %v18_v37, 64 }
  0x11   :  { %432 = vmatprep.subr.mxu1 %v500_v3  ;;  %392 = vmatprep.subr.mxu0 %v500_v3  ;;  %v27_v30 = vld [vmem:[%s682_s1 + $0x8] sm:$0xff]  ;;  %v323_v31 = vld [vmem:[%s682_s1 + $0x98] sm:$0xff]  ;;  %v26_v32 = vld [vmem:[%s682_s1] sm:$0xff] }
  0x12   :  { %433 = vmatpush3.msra.mxu1 %v33_v18  ;;  %393 = vmatpush3.msra.mxu0 %v329_v19  ;;  %v322_v33 = vld [vmem:[%s682_s1 + $0x90] sm:$0xff]  ;;  %v321_v34 = vld [vmem:[%s682_s1 + $0x88] sm:$0xff]  ;;  %v320_v35 = vld [vmem:[%s682_s1 + $0x80] sm:$0xff] }
  0x13   :  { %434 = vmatprep.subr.mxu1 %v500_v3  ;;  %394 = vmatprep.subr.mxu0 %v500_v3  ;;  %v214_v41 = vld [vmem:[%s683_s2 + $0x18] sm:$0xff]  ;;  %v213_v42 = vld [vmem:[%s683_s2 + $0x10] sm:$0xff]  ;;  %v212_v43 = vld [vmem:[%s683_s2 + $0x8] sm:$0xff] }
  0x14   :  { %435 = vmatpush3.msra.mxu1 %v32_v20  ;;  %395 = vmatpush3.msra.mxu0 %v328_v21  ;;  %v211_v44 = vld [vmem:[%s683_s2] sm:$0xff]  ;;  %s504_s2 = smov [#allocation2]  }
  0x15   :  { %436 = vmatprep.subr.mxu1 %v500_v3  ;;  %396 = vmatprep.subr.mxu0 %v500_v3  ;;  %s310_s28 = sshll.u32 %s504_s2, 4  ;;  %s311_s28 = int_to_ptr.vmem [resolvable:$true] %s310_s28 }
  0x16   :  { %437 = vmatpush3.msra.mxu1 %v31_v22  ;;  %397 = vmatpush3.msra.mxu0 %v327_v23  ;;  %s477_s29 = scalar_lea.vmem %s311_s28, 128  ;;  %p482_p1 = scmp.lt.s32.totalorder %s311_s28, %s311_s28 }
  0x17   :  { %438 = vmatprep.subr.mxu1 %v500_v3  ;;  %398 = vmatprep.subr.mxu0 %v500_v3  ;;  %p478_p0 = scmp.ne.s32.totalorder %s311_s28, %s477_s29  ;;  %p483_p2 = scmp.lt.s32.totalorder %s477_s29, %s477_s29 }
  0x18   :  { %439 = vmatpush3.msra.mxu1 %v30_v24  ;;  %399 = vmatpush3.msra.mxu0 %v326_v25 }
  0x19   :  { %440 = vmatprep.subr.mxu1 %v500_v3  ;;  %400 = vmatprep.subr.mxu0 %v500_v3  ;;  %p484_p3 = por %p483_p2, %p482_p1 }
  0x1a   :  { %441 = vmatpush3.msra.mxu1 %v29_v26  ;;  %401 = vmatpush3.msra.mxu0 %v325_v27 }
  0x1b   :  { %442 = vmatprep.subr.mxu1 %v500_v3  ;;  %402 = vmatprep.subr.mxu0 %v500_v3  ;;  %p485_p4 = pnand %p484_p3, %p478_p0 }
  0x1c   :  { %443 = vmatpush3.msra.mxu1 %v28_v28  ;;  %403 = vmatpush3.msra.mxu0 %v324_v29 }
  0x1d   :  { %444 = vmatprep.subr.mxu1 %v500_v3  ;;  %404 = vmatprep.subr.mxu0 %v500_v3 }
  0x1e   :  { %445 = vmatpush3.msra.mxu1 %v27_v30  ;;  %405 = vmatpush3.msra.mxu0 %v323_v31 }
  0x1f   :  { %446 = vmatprep.subr.mxu1 %v500_v3  ;;  %406 = vmatprep.subr.mxu0 %v500_v3 }
  0x20   :  { %447 = vmatpush3.msra.mxu1 %v26_v32  ;;  %448 = vmatprep.mubr.msk.bf16.mxu1 %vm502_vm0, %v500_v3 }
  0x21   :  { %407 = vmatpush3.msra.mxu0 %v322_v33  ;;  %412 = vmatprep.mubr.msk.bf16.mxu0 %vm502_vm0, %v500_v3 }
  0x22   :  { %408 = vmatprep.subr.mxu0 %v500_v3 }
  0x23   :  { %409 = vmatpush3.msra.mxu0 %v321_v34 }
  0x24   :  { %410 = vmatprep.subr.mxu0 %v500_v3 }
  0x25   :  { %411 = vmatpush3.msra.mxu0 %v320_v35 }
  0x26   :  { %452 = vmatprep.subr.mxu0 %v500_v3 }
  0x7d   :  { %v21_v38 = vpop.permute.xlu0 %20 }
  0x7e   :  { %vm22_vm1 = vcmp.eq.s32.totalorder %v18_v37, %v21_v38 }
  0x7f   :  { %vm338_vm2 = vmpackc.low %vm22_vm1, %vm22_vm1 }
  0x80   :  { %449 = vmatmul.mubr.msk.bf16.vlgmr.msra.gmra.mxu1 %vm338_vm2, %v503_v39 }
  0x82   :  { %v44_v40 = vpop.permute.xlu0 %43 }
  0x83   :  { %vm45_vm3 = vcmp.eq.s32.totalorder %v18_v37, %v44_v40 }
  0x84   :  { %vm336_vm4 = vmpackc.low %vm45_vm3, %vm45_vm3 }
  0x85   :  { %413 = vmatmul.mubr.msk.bf16.vlgmr.msra.gmra.mxu0 %vm336_vm4, %v503_v39 }
  0x86   :  { %460 = vmatprep.mubr.msk.f32.mxu0 %vm502_vm0, %v500_v3  ;;  %453 = vmatpush3.msra.mxu0 %v214_v41 }
  0x87   :  { %454 = vmatprep.subr.mxu0 %v500_v3 }
  0x88   :  { %455 = vmatpush3.msra.mxu0 %v213_v42 }
  0x89   :  { %456 = vmatprep.subr.mxu0 %v500_v3 }
  0x8a   :  { %457 = vmatpush3.msra.mxu0 %v212_v43 }
  0x8b   :  { %458 = vmatprep.subr.mxu0 %v500_v3 }
  0x8c   :  { %459 = vmatpush3.msra.mxu0 %v211_v44 }
 0x140   :  { %v204_v45 = vpop.f32.mrf.mxu1 }
 0x142   :  { %v450_v46 = vpop.f32.mrf.mxu1 }
 0x144   :  { %v207_v47 = vpop.f32.mrf.mxu1 }
 0x145   :  { %v132_v48 = vpop.f32.mrf.mxu0 }
 0x146   :  { %v205_v49 = vadd.f32 %v204_v45, %v132_v48  ;;  %v451_v50 = vpop.f32.mrf.mxu1 }
 0x147   :  { %v414_v51 = vpop.f32.mrf.mxu0 }
 0x148   :  { %471 = vtanh.f32 %v205_v49 }
 0x149   :  { %v135_v52 = vpop.f32.mrf.mxu0 }
 0x14b   :  { %v415_v53 = vpop.f32.mrf.mxu0 }
 0x155   :  { %v472_v54 = vpop.eup %471 }
 0x156   :  { %461 = vmatmul.mubr.msk.f32.vlgmr.msra.gmra.mxu0 %vm215_vm5, %v472_v54 }
 0x216   :  { %v285_v55 = vpop.f32.mrf.mxu0 }
 0x217   :  { %v292_v56 = vsel %vm289_vm6, %v285_v55, -1e+30 }
 0x218   :  { %293 = vmax.xlane.f32.xlu1 %v292_v56  ;;  %v462_v57 = vpop.f32.mrf.mxu0 }
 0x2a1   :  { %v294_v58 = vpop.xlane.xlu1 %293 }
 0x2a2   :  { %v295_v59 = vsub.f32 %v292_v56, %v294_v58 }
 0x2a4   :  { %v296_v60 = vmul.f32 1.442695, %v295_v59 }
 0x2a6   :  { %473 = vpow2.f32 %v296_v60 }
 0x2b3   :  { %v474_v61 = vpop.eup %473 }
 0x2b4   :  { %298 = vadd.xlane.f32.xlu1 %v474_v61 }
 0x33d   :  { %v299_v62 = vpop.xlane.xlu1 %298 }
 0x33e   :  { %475 = vlog2.f32 %v299_v62 }
 0x34b   :  { %v476_v63 = vpop.eup %475 }
 0x34c   :  { %v301_v0 = vmul.f32 0.6931472, %v476_v63 }
 0x34e   :  { %v302_v1 = vsub.f32 %v295_v59, %v301_v0 }
 0x350   :  { %303 = vst [vmem:[#allocation2] sm:$0xff] %v302_v1 }
 0x351   :  { %488 = shalt.err (!%p485_p4)
}
 0x352   :  { %313 = dma.vmem_to_hbm [thread:$0]  %s311_s28, 128, %s684_s3, [#allocation3]  }
 0x353   :  { %497 = dma.done.wait [#allocation3], 128  }
 0x354   :  { %498 = vsyncadd [#allocation3], 4294967168 }
 0x355   :  { %317 = vsyncpa [#allocation3], 1 }

// kernel: tpu_custom_call.1
= control target key start
LH: loop header
LB: loop body
LE: loop exit
PB: predicated region body
PF: predicated region fallthrough
CT: control target
= control target key end

     0   :  { %v499_v2 = vmov 0   ;;  %v500_v3 = vmov 0.0   ;;  %v501_v9 = vmov 1   ;;  %s681_s0 = inlined_call_operand.vmem [shape: s32[8,2], index: 0, kind: input, shape index: {}]   ;;  %s682_s1 = inlined_call_operand.vmem [shape: f32[2,128,32], index: 1, kind: input, shape index: {}]   ;;  %s683_s2 = inlined_call_operand.vmem [shape: f32[32,128], index: 2, kind: input, shape index: {}]   ;;  %s684_s3 = inlined_call_operand.hbm [shape: f32[8,128], index: 3, kind: output, shape index: {}]  }
   0x1   :  { %v16_v0 = vld [vmem:[%s681_s0] sm:$0xff]  ;;  %v41_v1 = vld [vmem:[%s682_s1 + $0x78] sm:$0xff]  ;;  %469 = vset.pattern.permute.xlu0 %v499_v2  ;;  %416 = vmatprep.subr.mxu1 %v500_v3  ;;  %v40_v4 = vld [vmem:[%s682_s1 + $0x70] sm:$0xff] }
   0x2   :  { %v335_v5 = vld [vmem:[%s682_s1 + $0xf8] sm:$0xff]  ;;  %20 = vperm.xlu0 %469, %v16_v0   ;;  %417 = vmatpush3.msra.mxu1 %v41_v1  ;;  %v39_v6 = vld [vmem:[%s682_s1 + $0x68] sm:$0xff]  ;;  %v38_v7 = vld [vmem:[%s682_s1 + $0x60] sm:$0xff] }
   0x3   :  { %418 = vmatprep.subr.mxu1 %v500_v3  ;;  %380 = vmatprep.subr.mxu0 %v500_v3  ;;  %v334_v8 = vld [vmem:[%s682_s1 + $0xf0] sm:$0xff]  ;;  %v37_v10 = vld [vmem:[%s682_s1 + $0x58] sm:$0xff]  ;;  %v333_v11 = vld [vmem:[%s682_s1 + $0xe8] sm:$0xff] }
   0x4   :  { %419 = vmatpush3.msra.mxu1 %v40_v4  ;;  %381 = vmatpush3.msra.mxu0 %v335_v5  ;;  %v36_v12 = vld [vmem:[%s682_s1 + $0x50] sm:$0xff]  ;;  %v332_v13 = vld [vmem:[%s682_s1 + $0xe0] sm:$0xff]  ;;  %v35_v14 = vld [vmem:[%s682_s1 + $0x48] sm:$0xff] }
   0x5   :  { %420 = vmatprep.subr.mxu1 %v500_v3  ;;  %382 = vmatprep.subr.mxu0 %v500_v3  ;;  %v331_v15 = vld [vmem:[%s682_s1 + $0xd8] sm:$0xff] }
   0x6   :  { %470 = vset.pattern.permute.xlu0 %v501_v9  ;;  %421 = vmatpush3.msra.mxu1 %v39_v6 }
   0x7   :  { %43 = vperm.xlu0 %470, %v16_v0   ;;  %422 = vmatprep.subr.mxu1 %v500_v3 }
   0x8   :  { %423 = vmatpush3.msra.mxu1 %v38_v7  ;;  %383 = vmatpush3.msra.mxu0 %v334_v8 }
   0x9   :  { %424 = vmatprep.subr.mxu1 %v500_v3  ;;  %384 = vmatprep.subr.mxu0 %v500_v3 }
   0xa   :  { %425 = vmatpush3.msra.mxu1 %v37_v10  ;;  %385 = vmatpush3.msra.mxu0 %v333_v11 }
   0xb   :  { %426 = vmatprep.subr.mxu1 %v500_v3  ;;  %386 = vmatprep.subr.mxu0 %v500_v3 }
   0xc   :  { %8 = vsyncpa [#allocation3], 0  ;;  %427 = vmatpush3.msra.mxu1 %v36_v12  ;;  %387 = vmatpush3.msra.mxu0 %v332_v13  ;;  %v34_v16 = vld [vmem:[%s682_s1 + $0x40] sm:$0xff]  ;;  %v330_v17 = vld [vmem:[%s682_s1 + $0xd0] sm:$0xff]  ;;  %vm502_vm0 = vmmov 0   ;;  %v17_v36 = vlaneseq  ;;  %vm215_vm5 = vcmask 261120  }
   0xd   :  { %428 = vmatprep.subr.mxu1 %v500_v3  ;;  %388 = vmatprep.subr.mxu0 %v500_v3  ;;  %v33_v18 = vld [vmem:[%s682_s1 + $0x38] sm:$0xff]  ;;  %v329_v19 = vld [vmem:[%s682_s1 + $0xc8] sm:$0xff]  ;;  %v32_v20 = vld [vmem:[%s682_s1 + $0x30] sm:$0xff]  ;;  %v503_v39 = vmov 1.0|1.0  }
   0xe   :  { %429 = vmatpush3.msra.mxu1 %v35_v14  ;;  %389 = vmatpush3.msra.mxu0 %v331_v15  ;;  %v328_v21 = vld [vmem:[%s682_s1 + $0xc0] sm:$0xff]  ;;  %v31_v22 = vld [vmem:[%s682_s1 + $0x28] sm:$0xff]  ;;  %v327_v23 = vld [vmem:[%s682_s1 + $0xb8] sm:$0xff]  ;;  %v18_v37 = vand.u32 127, %v17_v36 }
   0xf   :  { %430 = vmatprep.subr.mxu1 %v500_v3  ;;  %390 = vmatprep.subr.mxu0 %v500_v3  ;;  %v30_v24 = vld [vmem:[%s682_s1 + $0x20] sm:$0xff]  ;;  %v326_v25 = vld [vmem:[%s682_s1 + $0xb0] sm:$0xff]  ;;  %v29_v26 = vld [vmem:[%s682_s1 + $0x18] sm:$0xff] }
  0x10   :  { %431 = vmatpush3.msra.mxu1 %v34_v16  ;;  %391 = vmatpush3.msra.mxu0 %v330_v17  ;;  %v325_v27 = vld [vmem:[%s682_s1 + $0xa8] sm:$0xff]  ;;  %v28_v28 = vld [vmem:[%s682_s1 + $0x10] sm:$0xff]  ;;  %v324_v29 = vld [vmem:[%s682_s1 + $0xa0] sm:$0xff]  ;;  %vm289_vm6 = vcmp.lt.s32.totalorder %v18_v37, 64 }
  0x11   :  { %432 = vmatprep.subr.mxu1 %v500_v3  ;;  %392 = vmatprep.subr.mxu0 %v500_v3  ;;  %v27_v30 = vld [vmem:[%s682_s1 + $0x8] sm:$0xff]  ;;  %v323_v31 = vld [vmem:[%s682_s1 + $0x98] sm:$0xff]  ;;  %v26_v32 = vld [vmem:[%s682_s1] sm:$0xff] }
  0x12   :  { %433 = vmatpush3.msra.mxu1 %v33_v18  ;;  %393 = vmatpush3.msra.mxu0 %v329_v19  ;;  %v322_v33 = vld [vmem:[%s682_s1 + $0x90] sm:$0xff]  ;;  %v321_v34 = vld [vmem:[%s682_s1 + $0x88] sm:$0xff]  ;;  %v320_v35 = vld [vmem:[%s682_s1 + $0x80] sm:$0xff] }
  0x13   :  { %434 = vmatprep.subr.mxu1 %v500_v3  ;;  %394 = vmatprep.subr.mxu0 %v500_v3  ;;  %v214_v41 = vld [vmem:[%s683_s2 + $0x18] sm:$0xff]  ;;  %v213_v42 = vld [vmem:[%s683_s2 + $0x10] sm:$0xff]  ;;  %v212_v43 = vld [vmem:[%s683_s2 + $0x8] sm:$0xff] }
  0x14   :  { %435 = vmatpush3.msra.mxu1 %v32_v20  ;;  %395 = vmatpush3.msra.mxu0 %v328_v21  ;;  %v211_v44 = vld [vmem:[%s683_s2] sm:$0xff]  ;;  %s504_s2 = smov [#allocation2]  }
  0x15   :  { %436 = vmatprep.subr.mxu1 %v500_v3  ;;  %396 = vmatprep.subr.mxu0 %v500_v3  ;;  %s310_s28 = sshll.u32 %s504_s2, 4  ;;  %s311_s28 = int_to_ptr.vmem [resolvable:$true] %s310_s28 }
  0x16   :  { %437 = vmatpush3.msra.mxu1 %v31_v22  ;;  %397 = vmatpush3.msra.mxu0 %v327_v23  ;;  %s477_s29 = scalar_lea.vmem %s311_s28, 128  ;;  %p482_p1 = scmp.lt.s32.totalorder %s311_s28, %s311_s28 }
  0x17   :  { %438 = vmatprep.subr.mxu1 %v500_v3  ;;  %398 = vmatprep.subr.mxu0 %v500_v3  ;;  %p478_p0 = scmp.ne.s32.totalorder %s311_s28, %s477_s29  ;;  %p483_p2 = scmp.lt.s32.totalorder %s477_s29, %s477_s29 }
  0x18   :  { %439 = vmatpush3.msra.mxu1 %v30_v24  ;;  %399 = vmatpush3.msra.mxu0 %v326_v25 }
  0x19   :  { %440 = vmatprep.subr.mxu1 %v500_v3  ;;  %400 = vmatprep.subr.mxu0 %v500_v3  ;;  %p484_p3 = por %p483_p2, %p482_p1 }
  0x1a   :  { %441 = vmatpush3.msra.mxu1 %v29_v26  ;;  %401 = vmatpush3.msra.mxu0 %v325_v27 }
  0x1b   :  { %442 = vmatprep.subr.mxu1 %v500_v3  ;;  %402 = vmatprep.subr.mxu0 %v500_v3  ;;  %p485_p4 = pnand %p484_p3, %p478_p0 }
  0x1c   :  { %443 = vmatpush3.msra.mxu1 %v28_v28  ;;  %403 = vmatpush3.msra.mxu0 %v324_v29 }
  0x1d   :  { %444 = vmatprep.subr.mxu1 %v500_v3  ;;  %404 = vmatprep.subr.mxu0 %v500_v3 }
  0x1e   :  { %445 = vmatpush3.msra.mxu1 %v27_v30  ;;  %405 = vmatpush3.msra.mxu0 %v323_v31 }
  0x1f   :  { %446 = vmatprep.subr.mxu1 %v500_v3  ;;  %406 = vmatprep.subr.mxu0 %v500_v3 }
  0x20   :  { %447 = vmatpush3.msra.mxu1 %v26_v32  ;;  %448 = vmatprep.mubr.msk.bf16.mxu1 %vm502_vm0, %v500_v3 }
  0x21   :  { %407 = vmatpush3.msra.mxu0 %v322_v33  ;;  %412 = vmatprep.mubr.msk.bf16.mxu0 %vm502_vm0, %v500_v3 }
  0x22   :  { %408 = vmatprep.subr.mxu0 %v500_v3 }
  0x23   :  { %409 = vmatpush3.msra.mxu0 %v321_v34 }
  0x24   :  { %410 = vmatprep.subr.mxu0 %v500_v3 }
  0x25   :  { %411 = vmatpush3.msra.mxu0 %v320_v35 }
  0x26   :  { %452 = vmatprep.subr.mxu0 %v500_v3 }
  0x7d   :  { %v21_v38 = vpop.permute.xlu0 %20 }
  0x7e   :  { %vm22_vm1 = vcmp.eq.s32.totalorder %v18_v37, %v21_v38 }
  0x7f   :  { %vm338_vm2 = vmpackc.low %vm22_vm1, %vm22_vm1 }
  0x80   :  { %449 = vmatmul.mubr.msk.bf16.vlgmr.msra.gmra.mxu1 %vm338_vm2, %v503_v39 }
  0x82   :  { %v44_v40 = vpop.permute.xlu0 %43 }
  0x83   :  { %vm45_vm3 = vcmp.eq.s32.totalorder %v18_v37, %v44_v40 }
  0x84   :  { %vm336_vm4 = vmpackc.low %vm45_vm3, %vm45_vm3 }
  0x85   :  { %413 = vmatmul.mubr.msk.bf16.vlgmr.msra.gmra.mxu0 %vm336_vm4, %v503_v39 }
  0x86   :  { %460 = vmatprep.mubr.msk.f32.mxu0 %vm502_vm0, %v500_v3  ;;  %453 = vmatpush3.msra.mxu0 %v214_v41 }
  0x87   :  { %454 = vmatprep.subr.mxu0 %v500_v3 }
  0x88   :  { %455 = vmatpush3.msra.mxu0 %v213_v42 }
  0x89   :  { %456 = vmatprep.subr.mxu0 %v500_v3 }
  0x8a   :  { %457 = vmatpush3.msra.mxu0 %v212_v43 }
  0x8b   :  { %458 = vmatprep.subr.mxu0 %v500_v3 }
  0x8c   :  { %459 = vmatpush3.msra.mxu0 %v211_v44 }
 0x140   :  { %v204_v45 = vpop.f32.mrf.mxu1 }
 0x142   :  { %v450_v46 = vpop.f32.mrf.mxu1 }
 0x144   :  { %v207_v47 = vpop.f32.mrf.mxu1 }
 0x145   :  { %v132_v48 = vpop.f32.mrf.mxu0 }
 0x146   :  { %v205_v49 = vadd.f32 %v204_v45, %v132_v48  ;;  %v451_v50 = vpop.f32.mrf.mxu1 }
 0x147   :  { %v414_v51 = vpop.f32.mrf.mxu0 }
 0x148   :  { %471 = vtanh.f32 %v205_v49 }
 0x149   :  { %v135_v52 = vpop.f32.mrf.mxu0 }
 0x14b   :  { %v415_v53 = vpop.f32.mrf.mxu0 }
 0x155   :  { %v472_v54 = vpop.eup %471 }
 0x156   :  { %461 = vmatmul.mubr.msk.f32.vlgmr.msra.gmra.mxu0 %vm215_vm5, %v472_v54 }
 0x216   :  { %v285_v55 = vpop.f32.mrf.mxu0 }
 0x217   :  { %v292_v56 = vsel %vm289_vm6, %v285_v55, -1e+30 }
 0x218   :  { %293 = vmax.xlane.f32.xlu1 %v292_v56  ;;  %v462_v57 = vpop.f32.mrf.mxu0 }
 0x2a1   :  { %v294_v58 = vpop.xlane.xlu1 %293 }
 0x2a2   :  { %v295_v59 = vsub.f32 %v292_v56, %v294_v58 }
 0x2a4   :  { %v296_v60 = vmul.f32 1.442695, %v295_v59 }
 0x2a6   :  { %473 = vpow2.f32 %v296_v60 }
 0x2b3   :  { %v474_v61 = vpop.eup %473 }
 0x2b4   :  { %298 = vadd.xlane.f32.xlu1 %v474_v61 }
 0x33d   :  { %v299_v62 = vpop.xlane.xlu1 %298 }
 0x33e   :  { %475 = vlog2.f32 %v299_v62 }
 0x34b   :  { %v476_v63 = vpop.eup %475 }
 0x34c   :  { %v301_v0 = vmul.f32 0.6931472, %v476_v63 }
 0x34e   :  { %v302_v1 = vsub.f32 %v295_v59, %v301_v0 }
 0x350   :  { %303 = vst [vmem:[#allocation2] sm:$0xff] %v302_v1 }
 0x351   :  { %488 = shalt.err (!%p485_p4)
}
 0x352   :  { %313 = dma.vmem_to_hbm [thread:$0]  %s311_s28, 128, %s684_s3, [#allocation3]  }
 0x353   :  { %497 = dma.done.wait [#allocation3], 128  }
 0x354   :  { %498 = vsyncadd [#allocation3], 4294967168 }
 0x355   :  { %317 = vsyncpa [#allocation3], 1 }

</bundles_post_ra>
